<compile_context>
chip_gen: v7x
topology: tpu7x:2x2x1
jax: 0.10.0
libtpu: 0.0.40
codegen_flags: <defaults>
</compile_context>

<pallas_src>
import functools
import numpy as np
import jax
import jax.numpy as jnp
from jax.experimental import pallas as pl
from jax.experimental.pallas import tpu as pltpu

EPS = 1e-7


def _round_up(x, m):
    return ((x + m - 1) // m) * m


def _scatter_colors_kernel(blk_lo_ref, blk_hi_ref, p_ref, cols_ref, img_ref,
                           out_ref, *, n_chunk):
    """Grid = (pixel tiles, point blocks).

    The output tile stays resident in VMEM across the sequential ("arbitrary")
    point-block axis: at k == 0 it is initialized from the image, and every
    in-range point block overwrites the pixels it hits (last point wins).
    """
    i = pl.program_id(0)                       # pixel-tile index
    k = pl.program_id(1)                       # point-block index
    C, tile = out_ref.shape
    block_n = p_ref.shape[0]
    num_sub = block_n // n_chunk

    @pl.when(k == 0)
    def _init():
        out_ref[...] = img_ref[...]

    # Points were bucketed (stable sort) by pixel tile in the wrapper, so only
    # blocks in [blk_lo[i], blk_hi[i]) can hit this tile; skip everything else.
    @pl.when(jnp.logical_and(k >= blk_lo_ref[i], k < blk_hi_ref[i]))
    def _process():
        base = i * tile
        # Flat pixel ids covered by this image tile (lane-dense).
        q = base + jax.lax.broadcasted_iota(jnp.int32, (1, tile), 1)
        # Local point index along sublanes (constant across sub-chunks).
        n_loc = jax.lax.broadcasted_iota(jnp.int32, (n_chunk, tile), 0)
        neg_inf = jnp.float32(-jnp.inf)

        def body(c, rows):
            off = pl.multiple_of(c * n_chunk, n_chunk)
            p_c = p_ref[pl.ds(off, n_chunk), :]            # [n_chunk, 1]
            cols = cols_ref[pl.ds(off, n_chunk), :]        # [n_chunk, C]

            # Winner (= largest local index) among this sub-chunk's hits.
            cand = jnp.where(p_c == q, n_loc, -1)          # [n_chunk, tile]
            best = jnp.max(cand, axis=0, keepdims=True)    # [1, tile]
            win = cand == best                             # one-hot when best>=0
            written = best >= 0                            # [1, tile]

            new_rows = []
            for ch in range(C):
                col = cols[:, ch:ch + 1]                   # [n_chunk, 1]
                # Exact f32 "gather" of the winning point's color: select +
                # sublane max-reduce (no MXU, bit-exact vs. the reference).
                val = jnp.max(jnp.where(win, col, neg_inf),
                              axis=0, keepdims=True)       # [1, tile]
                new_rows.append(jnp.where(written, val, rows[ch]))
            return tuple(new_rows)

        rows0 = tuple(out_ref[ch:ch + 1, :] for ch in range(C))
        rows = jax.lax.fori_loop(0, num_sub, body, rows0,
                                 unroll=min(2, num_sub))
        for ch in range(C):
            out_ref[ch:ch + 1, :] = rows[ch]


@functools.partial(jax.jit, static_argnames=("tile_hw", "n_chunk", "block_n"))
def project_color_onto_image(image_grid, query_points, query_colors, intrinsics,
                             *, tile_hw=512, n_chunk=32, block_n=1024):
    """image_grid: [C, H, W]; query_points: [1, N, 3]; query_colors: [N, C];
    intrinsics: [3, 3].  Returns [1, C, H, W], matching the PyTorch module."""
    C, H, W = image_grid.shape
    N = query_points.shape[1]
    HW = H * W

    # ---- Project3D, hoisted into XLA (default T => identity rot, zero trans) ----
    pts = query_points[0].astype(jnp.float32)                  # [N, 3]
    K = jnp.asarray(intrinsics, jnp.float32)                   # [3, 3]
    pix = jnp.sum(pts[:, None, :] * K[None, :, :], axis=-1)    # pts @ K^T, exact f32
    z = pix[:, 2] + EPS
    x = pix[:, 0] / z
    y = pix[:, 1] / z
    # TODO(synk): points with z ~ -EPS give inf/NaN pixel coords; clip maps inf
    # to the border, NaN->int is undefined — same caveat as the PyTorch code.
    xi = jnp.clip(jnp.floor(x - 0.5), 0.0, float(W - 1)).astype(jnp.int32)
    yi = jnp.clip(jnp.floor(y - 0.5), 0.0, float(H - 1)).astype(jnp.int32)
    p = yi * W + xi                                             # flat pixel id, [N]

    # ---- static tiling parameters ----
    tile_hw = max(128, _round_up(min(tile_hw, _round_up(HW, 128)), 128))
    HW_pad = _round_up(HW, tile_hw)
    num_tiles = HW_pad // tile_hw
    n_chunk = max(8, _round_up(min(n_chunk, _round_up(N, 8)), 8))
    block_n = max(n_chunk, _round_up(min(block_n, _round_up(N, n_chunk)), n_chunk))
    N_pad = _round_up(N, block_n)
    num_blocks = N_pad // block_n

    # ---- bucket points by pixel tile (stable => last-write-wins preserved) ----
    tile_id = p // tile_hw                                      # [N] in [0, num_tiles)
    order = jnp.argsort(tile_id, stable=True)
    p_sorted = p[order]
    cols_sorted = query_colors.astype(jnp.float32)[order]       # [N, C]

    counts = jnp.bincount(tile_id, length=num_tiles)            # points per tile
    hi = jnp.cumsum(counts)
    lo = hi - counts
    blk_lo = jnp.minimum(lo // block_n, num_blocks - 1).astype(jnp.int32)
    blk_hi = jnp.where(counts > 0,
                       (hi + block_n - 1) // block_n, blk_lo).astype(jnp.int32)

    p_pad = jnp.full((N_pad, 1), -1, jnp.int32).at[:N, 0].set(p_sorted)
    colors_pad = jnp.zeros((N_pad, C), jnp.float32).at[:N, :].set(cols_sorted)
    img_pad = jnp.pad(image_grid.reshape(C, HW).astype(jnp.float32),
                      ((0, 0), (0, HW_pad - HW)))

    def point_block_map(i, k, lo_ref, hi_ref):
        # Out-of-range steps re-use an already fetched block (the pipeline
        # skips the DMA when the block index does not change).
        lo_b = lo_ref[i]
        hi_b = jnp.maximum(hi_ref[i], lo_b + 1)
        return (jnp.clip(k, lo_b, hi_b - 1), 0)

    out = pl.pallas_call(
        functools.partial(_scatter_colors_kernel, n_chunk=n_chunk),
        out_shape=jax.ShapeDtypeStruct((C, HW_pad), jnp.float32),
        grid_spec=pltpu.PrefetchScalarGridSpec(
            num_scalar_prefetch=2,
            grid=(num_tiles, num_blocks),
            in_specs=[
                pl.BlockSpec((block_n, 1), point_block_map),        # pixel ids
                pl.BlockSpec((block_n, C), point_block_map),        # colors
                pl.BlockSpec((C, tile_hw), lambda i, k, lo, hi: (0, i)),   # image
            ],
            out_specs=pl.BlockSpec((C, tile_hw), lambda i, k, lo, hi: (0, i)),
        ),
        # 4 == index of img_pad among ALL operands (incl. the 2 prefetch arrays).
        input_output_aliases={4: 0},
        compiler_params=pltpu.CompilerParams(
            dimension_semantics=("parallel", "arbitrary"),
            vmem_limit_bytes=32 * 1024 * 1024),
    )(blk_lo, blk_hi, p_pad, colors_pad, img_pad)

    return out[:, :HW].reshape(1, C, H, W)


def _reference(image_grid, query_points, query_colors, intrinsics):
    """Pure NumPy reference mirroring the PyTorch forward."""
    img = np.asarray(image_grid, np.float32)                    # [C, H, W]
    C, H, W = img.shape
    pts = np.asarray(query_points, np.float32)[0]               # [N, 3]
    K = np.asarray(intrinsics, np.float32)
    cols = np.asarray(query_colors, np.float32)                 # [N, C]

    pix = pts @ K.T
    xy = pix[:, :2] / (pix[:, 2:3] + EPS)
    x = np.clip(np.floor(xy[:, 0] - 0.5).astype(np.int64), 0, W - 1)
    y = np.clip(np.floor(xy[:, 1] - 0.5).astype(np.int64), 0, H - 1)

    out = img[None].copy()                                      # [1, C, H, W]
    for n in range(pts.shape[0]):                               # last write wins
        out[0, :, y[n], x[n]] = cols[n]
    return out


if __name__ == "__main__":
    root = jax.random.PRNGKey(0)

    def run_case(case_id, C, H, W, N, tile_hw, n_chunk, block_n, dup=False):
        key = jax.random.fold_in(root, case_id)
        k_img, k_xy, k_z, k_col = jax.random.split(key, 4)

        image_grid = jax.random.uniform(k_img, (C, H, W), jnp.float32)
        xy = jax.random.uniform(k_xy, (1, N, 2), jnp.float32, -1.0, 1.0)
        z = jax.random.uniform(k_z, (1, N, 1), jnp.float32, 1.0, 2.0)
        query_points = jnp.concatenate([xy, z], axis=-1)                  # [1, N, 3]
        if dup:
            # Force duplicate pixel targets to exercise last-write-wins.
            half = N // 2
            query_points = query_points.at[0, half:].set(query_points[0, :N - half])
        query_colors = jax.random.uniform(k_col, (N, C), jnp.float32)     # [N, C]
        intrinsics = jnp.array([[10.0, 0.0, W / 2.0],
                                [0.0, 10.0, H / 2.0],
                                [0.0, 0.0, 1.0]], jnp.float32)

        out = project_color_onto_image(image_grid, query_points, query_colors,
                                       intrinsics, tile_hw=tile_hw,
                                       n_chunk=n_chunk, block_n=block_n)
        out = jax.block_until_ready(out)

        ref = _reference(image_grid, query_points, query_colors, intrinsics)
        np.testing.assert_allclose(np.asarray(out), ref, rtol=1e-4, atol=1e-4)

    # Small case consistent with the module: 2 pixel tiles x 2 point blocks.
    run_case(0, C=3, H=16, W=16, N=24, tile_hw=128, n_chunk=8, block_n=16)
    # Non-multiple shapes + duplicate targets: 4 pixel tiles, 3 point blocks,
    # 2 sub-chunks/block; exercises bucketing (sort + per-tile block ranges),
    # block skipping, HW/N padding and cross-block last-write-wins.
    run_case(1, C=3, H=20, W=20, N=40, tile_hw=128, n_chunk=8, block_n=16, dup=True)

    print("KERNEL_OK")
</pallas_src>

<mosaic_0001>
module attributes {stable_mosaic.version = 11 : i64} {
  func.func @_scatter_colors_kernel(%arg0: i32, %arg1: i32, %arg2: memref<2xi32, #tpu.memory_space<smem>>, %arg3: memref<2xi32, #tpu.memory_space<smem>>, %arg4: memref<16x1xi32, #tpu.memory_space<vmem>>, %arg5: memref<16x3xf32, #tpu.memory_space<vmem>>, %arg6: memref<3x128xf32, #tpu.memory_space<vmem>>, %arg7: memref<3x128xf32, #tpu.memory_space<vmem>>) attributes {dimension_semantics = [#tpu.dimension_semantics<parallel>, #tpu.dimension_semantics<arbitrary>], iteration_bounds = array<i64: 2, 2>, scalar_prefetch = 2 : i64, scratch_operands = 0 : i64, tpu.core_type = #tpu.core_type<tc>, window_params = [{transform_indices = @transform_0, window_bounds = array<i64: 16, 1>}, {transform_indices = @transform_1, window_bounds = array<i64: 16, 3>}, {transform_indices = @transform_2, window_bounds = array<i64: 3, 128>}, {transform_indices = @transform_3, window_bounds = array<i64: 3, 128>}]} {
    %c0_i32 = arith.constant 0 : i32
    %0 = arith.cmpi eq, %arg1, %c0_i32 : i32
    %1 = arith.extui %0 : i1 to i32
    %c0_i32_0 = arith.constant 0 : i32
    %2 = arith.cmpi ne, %1, %c0_i32_0 : i32
    scf.if %2 {
      %c0 = arith.constant 0 : index
      %c0_2 = arith.constant 0 : index
      %12 = vector.load %arg6[%c0, %c0_2] : memref<3x128xf32, #tpu.memory_space<vmem>>, vector<3x128xf32>
      %c0_3 = arith.constant 0 : index
      %c0_4 = arith.constant 0 : index
      %13 = vector.load %arg7[%c0_3, %c0_4] : memref<3x128xf32, #tpu.memory_space<vmem>>, vector<3x128xf32>
      tpu.vector_store %arg7[%c0_3, %c0_4], %12 {strides = array<i32>} : memref<3x128xf32, #tpu.memory_space<vmem>>, vector<3x128xf32>,
    } else {
    }
    %3 = arith.index_cast %arg0 : i32 to index
    %4 = memref.load %arg2[%3] : memref<2xi32, #tpu.memory_space<smem>>
    %5 = arith.cmpi sge, %arg1, %4 : i32
    %6 = arith.index_cast %arg0 : i32 to index
    %7 = memref.load %arg3[%6] : memref<2xi32, #tpu.memory_space<smem>>
    %8 = arith.cmpi slt, %arg1, %7 : i32
    %9 = arith.andi %5, %8 : i1
    %10 = arith.extui %9 : i1 to i32
    %c0_i32_1 = arith.constant 0 : i32
    %11 = arith.cmpi ne, %10, %c0_i32_1 : i32
    scf.if %11 {
      %c128_i32 = arith.constant 128 : i32
      %12 = arith.muli %arg0, %c128_i32 : i32
      %13 = tpu.iota {dimensions = array<i32: 1>} : vector<1x128xi32>
      %14 = vector.broadcast %12 : i32 to vector<1x128xi32>
      %15 = arith.addi %14, %13 : vector<1x128xi32>
      %16 = tpu.iota {dimensions = array<i32: 0>} : vector<8x128xi32>
      %c0 = arith.constant 0 : index
      %c0_2 = arith.constant 0 : index
      %17 = vector.load %arg7[%c0, %c0_2] : memref<3x128xf32, #tpu.memory_space<vmem>>, vector<1x128xf32>
      %c1 = arith.constant 1 : index
      %c0_3 = arith.constant 0 : index
      %18 = vector.load %arg7[%c1, %c0_3] : memref<3x128xf32, #tpu.memory_space<vmem>>, vector<1x128xf32>
      %c2 = arith.constant 2 : index
      %c0_4 = arith.constant 0 : index
      %19 = vector.load %arg7[%c2, %c0_4] : memref<3x128xf32, #tpu.memory_space<vmem>>, vector<1x128xf32>
      %cst = arith.constant 0xFF800000 : f32
      %c0_i32_5 = arith.constant 0 : i32
      %c8_i32 = arith.constant 8 : i32
      %20 = arith.muli %c0_i32_5, %c8_i32 : i32
      %21 = tpu.assume_multiple %20, 8 : i32
      %22 = arith.index_cast %21 : i32 to index
      %c0_6 = arith.constant 0 : index
      %23 = vector.load %arg4[%22, %c0_6] : memref<16x1xi32, #tpu.memory_space<vmem>>, vector<8x1xi32>
      %24 = arith.index_cast %21 : i32 to index
      %c0_7 = arith.constant 0 : index
      %25 = vector.load %arg5[%24, %c0_7] : memref<16x3xf32, #tpu.memory_space<vmem>>, vector<8x3xf32>
      %26 = vector.broadcast %23 : vector<8x1xi32> to vector<8x128xi32>
      %27 = vector.broadcast %15 : vector<1x128xi32> to vector<8x128xi32>
      %28 = arith.cmpi eq, %26, %27 : vector<8x128xi32>
      %c-1_i32 = arith.constant -1 : i32
      %29 = vector.broadcast %c-1_i32 : i32 to vector<8x128xi32>
      %30 = arith.select %28, %16, %29 : vector<8x128xi1>, vector<8x128xi32>
      %cst_8 = arith.constant dense<-2147483648> : vector<128xi32>
      %31 = vector.multi_reduction <maxsi>, %30, %cst_8 [0] : vector<8x128xi32> to vector<128xi32>
      %32 = vector.shape_cast %31 : vector<128xi32> to vector<1x128xi32>
      %33 = vector.broadcast %32 : vector<1x128xi32> to vector<8x128xi32>
      %34 = arith.cmpi eq, %30, %33 : vector<8x128xi32>
      %c0_i32_9 = arith.constant 0 : i32
      %35 = vector.broadcast %c0_i32_9 : i32 to vector<1x128xi32>
      %36 = arith.cmpi sge, %32, %35 : vector<1x128xi32>
      %37 = vector.extract_strided_slice %25 {offsets = [0, 0], sizes = [8, 1], strides = [1, 1]} : vector<8x3xf32> to vector<8x1xf32>
      %38 = vector.shape_cast %37 : vector<8x1xf32> to vector<8x1xf32>
      %39 = vector.broadcast %38 : vector<8x1xf32> to vector<8x128xf32>
      %40 = vector.broadcast %cst : f32 to vector<8x128xf32>
      %41 = arith.select %34, %39, %40 : vector<8x128xi1>, vector<8x128xf32>
      %cst_10 = arith.constant dense<0xFF800000> : vector<128xf32>
      %42 = vector.multi_reduction <maximumf>, %41, %cst_10 [0] : vector<8x128xf32> to vector<128xf32>
      %43 = vector.shape_cast %42 : vector<128xf32> to vector<1x128xf32>
      %44 = arith.select %36, %43, %17 : vector<1x128xi1>, vector<1x128xf32>
      %45 = vector.extract_strided_slice %25 {offsets = [0, 1], sizes = [8, 1], strides = [1, 1]} : vector<8x3xf32> to vector<8x1xf32>
      %46 = vector.shape_cast %45 : vector<8x1xf32> to vector<8x1xf32>
      %47 = vector.broadcast %46 : vector<8x1xf32> to vector<8x128xf32>
      %48 = vector.broadcast %cst : f32 to vector<8x128xf32>
      %49 = arith.select %34, %47, %48 : vector<8x128xi1>, vector<8x128xf32>
      %cst_11 = arith.constant dense<0xFF800000> : vector<128xf32>
      %50 = vector.multi_reduction <maximumf>, %49, %cst_11 [0] : vector<8x128xf32> to vector<128xf32>
      %51 = vector.shape_cast %50 : vector<128xf32> to vector<1x128xf32>
      %52 = arith.select %36, %51, %18 : vector<1x128xi1>, vector<1x128xf32>
      %53 = vector.extract_strided_slice %25 {offsets = [0, 2], sizes = [8, 1], strides = [1, 1]} : vector<8x3xf32> to vector<8x1xf32>
      %54 = vector.shape_cast %53 : vector<8x1xf32> to vector<8x1xf32>
      %55 = vector.broadcast %54 : vector<8x1xf32> to vector<8x128xf32>
      %56 = vector.broadcast %cst : f32 to vector<8x128xf32>
      %57 = arith.select %34, %55, %56 : vector<8x128xi1>, vector<8x128xf32>
      %cst_12 = arith.constant dense<0xFF800000> : vector<128xf32>
      %58 = vector.multi_reduction <maximumf>, %57, %cst_12 [0] : vector<8x128xf32> to vector<128xf32>
      %59 = vector.shape_cast %58 : vector<128xf32> to vector<1x128xf32>
      %60 = arith.select %36, %59, %19 : vector<1x128xi1>, vector<1x128xf32>
      %c1_i32 = arith.constant 1 : i32
      %c8_i32_13 = arith.constant 8 : i32
      %61 = arith.muli %c1_i32, %c8_i32_13 : i32
      %62 = tpu.assume_multiple %61, 8 : i32
      %63 = arith.index_cast %62 : i32 to index
      %c0_14 = arith.constant 0 : index
      %64 = vector.load %arg4[%63, %c0_14] : memref<16x1xi32, #tpu.memory_space<vmem>>, vector<8x1xi32>
      %65 = arith.index_cast %62 : i32 to index
      %c0_15 = arith.constant 0 : index
      %66 = vector.load %arg5[%65, %c0_15] : memref<16x3xf32, #tpu.memory_space<vmem>>, vector<8x3xf32>
      %67 = vector.broadcast %64 : vector<8x1xi32> to vector<8x128xi32>
      %68 = vector.broadcast %15 : vector<1x128xi32> to vector<8x128xi32>
      %69 = arith.cmpi eq, %67, %68 : vector<8x128xi32>
      %c-1_i32_16 = arith.constant -1 : i32
      %70 = vector.broadcast %c-1_i32_16 : i32 to vector<8x128xi32>
      %71 = arith.select %69, %16, %70 : vector<8x128xi1>, vector<8x128xi32>
      %cst_17 = arith.constant dense<-2147483648> : vector<128xi32>
      %72 = vector.multi_reduction <maxsi>, %71, %cst_17 [0] : vector<8x128xi32> to vector<128xi32>
      %73 = vector.shape_cast %72 : vector<128xi32> to vector<1x128xi32>
      %74 = vector.broadcast %73 : vector<1x128xi32> to vector<8x128xi32>
      %75 = arith.cmpi eq, %71, %74 : vector<8x128xi32>
      %c0_i32_18 = arith.constant 0 : i32
      %76 = vector.broadcast %c0_i32_18 : i32 to vector<1x128xi32>
      %77 = arith.cmpi sge, %73, %76 : vector<1x128xi32>
      %78 = vector.extract_strided_slice %66 {offsets = [0, 0], sizes = [8, 1], strides = [1, 1]} : vector<8x3xf32> to vector<8x1xf32>
      %79 = vector.shape_cast %78 : vector<8x1xf32> to vector<8x1xf32>
      %80 = vector.broadcast %79 : vector<8x1xf32> to vector<8x128xf32>
      %81 = vector.broadcast %cst : f32 to vector<8x128xf32>
      %82 = arith.select %75, %80, %81 : vector<8x128xi1>, vector<8x128xf32>
      %cst_19 = arith.constant dense<0xFF800000> : vector<128xf32>
      %83 = vector.multi_reduction <maximumf>, %82, %cst_19 [0] : vector<8x128xf32> to vector<128xf32>
      %84 = vector.shape_cast %83 : vector<128xf32> to vector<1x128xf32>
      %85 = arith.select %77, %84, %44 : vector<1x128xi1>, vector<1x128xf32>
      %86 = vector.extract_strided_slice %66 {offsets = [0, 1], sizes = [8, 1], strides = [1, 1]} : vector<8x3xf32> to vector<8x1xf32>
      %87 = vector.shape_cast %86 : vector<8x1xf32> to vector<8x1xf32>
      %88 = vector.broadcast %87 : vector<8x1xf32> to vector<8x128xf32>
      %89 = vector.broadcast %cst : f32 to vector<8x128xf32>
      %90 = arith.select %75, %88, %89 : vector<8x128xi1>, vector<8x128xf32>
      %cst_20 = arith.constant dense<0xFF800000> : vector<128xf32>
      %91 = vector.multi_reduction <maximumf>, %90, %cst_20 [0] : vector<8x128xf32> to vector<128xf32>
      %92 = vector.shape_cast %91 : vector<128xf32> to vector<1x128xf32>
      %93 = arith.select %77, %92, %52 : vector<1x128xi1>, vector<1x128xf32>
      %94 = vector.extract_strided_slice %66 {offsets = [0, 2], sizes = [8, 1], strides = [1, 1]} : vector<8x3xf32> to vector<8x1xf32>
      %95 = vector.shape_cast %94 : vector<8x1xf32> to vector<8x1xf32>
      %96 = vector.broadcast %95 : vector<8x1xf32> to vector<8x128xf32>
      %97 = vector.broadcast %cst : f32 to vector<8x128xf32>
      %98 = arith.select %75, %96, %97 : vector<8x128xi1>, vector<8x128xf32>
      %cst_21 = arith.constant dense<0xFF800000> : vector<128xf32>
      %99 = vector.multi_reduction <maximumf>, %98, %cst_21 [0] : vector<8x128xf32> to vector<128xf32>
      %100 = vector.shape_cast %99 : vector<128xf32> to vector<1x128xf32>
      %101 = arith.select %77, %100, %60 : vector<1x128xi1>, vector<1x128xf32>
      %c2_i32 = arith.constant 2 : i32
      %c0_22 = arith.constant 0 : index
      %c0_23 = arith.constant 0 : index
      %102 = vector.load %arg7[%c0_22, %c0_23] : memref<3x128xf32, #tpu.memory_space<vmem>>, vector<1x128xf32>
      tpu.vector_store %arg7[%c0_22, %c0_23], %85 {strides = array<i32>} : memref<3x128xf32, #tpu.memory_space<vmem>>, vector<1x128xf32>,
      %c1_24 = arith.constant 1 : index
      %c0_25 = arith.constant 0 : index
      %103 = vector.load %arg7[%c1_24, %c0_25] : memref<3x128xf32, #tpu.memory_space<vmem>>, vector<1x128xf32>
      tpu.vector_store %arg7[%c1_24, %c0_25], %93 {strides = array<i32>} : memref<3x128xf32, #tpu.memory_space<vmem>>, vector<1x128xf32>,
      %c2_26 = arith.constant 2 : index
      %c0_27 = arith.constant 0 : index
      %104 = vector.load %arg7[%c2_26, %c0_27] : memref<3x128xf32, #tpu.memory_space<vmem>>, vector<1x128xf32>
      tpu.vector_store %arg7[%c2_26, %c0_27], %101 {strides = array<i32>} : memref<3x128xf32, #tpu.memory_space<vmem>>, vector<1x128xf32>,
    } else {
    }
    return
  }
  func.func @transform_0(%arg0: i32, %arg1: i32, %arg2: memref<2xi32, #tpu.memory_space<smem>>, %arg3: memref<2xi32, #tpu.memory_space<smem>>) -> (i32, i32) {
    %0 = arith.index_cast %arg0 : i32 to index
    %1 = memref.load %arg2[%0] : memref<2xi32, #tpu.memory_space<smem>>
    %2 = arith.index_cast %arg0 : i32 to index
    %3 = memref.load %arg3[%2] : memref<2xi32, #tpu.memory_space<smem>>
    %c1_i32 = arith.constant 1 : i32
    %4 = arith.addi %1, %c1_i32 : i32
    %5 = arith.maxsi %3, %4 : i32
    %c1_i32_0 = arith.constant 1 : i32
    %6 = arith.subi %5, %c1_i32_0 : i32
    %7 = arith.maxsi %1, %arg1 : i32
    %8 = arith.minsi %6, %7 : i32
    %c0_i32 = arith.constant 0 : i32
    %c0_i32_1 = arith.constant 0 : i32
    return %8, %c0_i32 : i32, i32
  }
  func.func @transform_1(%arg0: i32, %arg1: i32, %arg2: memref<2xi32, #tpu.memory_space<smem>>, %arg3: memref<2xi32, #tpu.memory_space<smem>>) -> (i32, i32) {
    %0 = arith.index_cast %arg0 : i32 to index
    %1 = memref.load %arg2[%0] : memref<2xi32, #tpu.memory_space<smem>>
    %2 = arith.index_cast %arg0 : i32 to index
    %3 = memref.load %arg3[%2] : memref<2xi32, #tpu.memory_space<smem>>
    %c1_i32 = arith.constant 1 : i32
    %4 = arith.addi %1, %c1_i32 : i32
    %5 = arith.maxsi %3, %4 : i32
    %c1_i32_0 = arith.constant 1 : i32
    %6 = arith.subi %5, %c1_i32_0 : i32
    %7 = arith.maxsi %1, %arg1 : i32
    %8 = arith.minsi %6, %7 : i32
    %c0_i32 = arith.constant 0 : i32
    %c0_i32_1 = arith.constant 0 : i32
    return %8, %c0_i32 : i32, i32
  }
  func.func @transform_2(%arg0: i32, %arg1: i32, %arg2: memref<2xi32, #tpu.memory_space<smem>>, %arg3: memref<2xi32, #tpu.memory_space<smem>>) -> (i32, i32) {
    %c0_i32 = arith.constant 0 : i32
    %c0_i32_0 = arith.constant 0 : i32
    return %c0_i32, %arg0 : i32, i32
  }
  func.func @transform_3(%arg0: i32, %arg1: i32, %arg2: memref<2xi32, #tpu.memory_space<smem>>, %arg3: memref<2xi32, #tpu.memory_space<smem>>) -> (i32, i32) {
    %c0_i32 = arith.constant 0 : i32
    %c0_i32_0 = arith.constant 0 : i32
    return %c0_i32, %arg0 : i32, i32
  }
}

</mosaic_0001>

<bundles_post_ra>
// kernel: project_color_onto_image.1
= control target key start
LH: loop header
LB: loop body
LE: loop exit
PB: predicated region body
PF: predicated region fallthrough
CT: control target
= control target key end

     0   :  { %s868_s0 = inlined_call_operand.vmem [shape: s32[2], index: 0, kind: input, shape index: {}]   ;;  %s869_s2 = inlined_call_operand.vmem [shape: s32[32,1], index: 2, kind: input, shape index: {}]   ;;  %s870_s3 = inlined_call_operand.vmem [shape: f32[32,3], index: 3, kind: input, shape index: {}]   ;;  %s871_s4 = inlined_call_operand.vmem [shape: f32[3,256], index: 4, kind: input, shape index: {}, may-alias: {4,5}]   ;;  %s872_s5 = inlined_call_operand.vmem [shape: f32[3,256], index: 5, kind: output, shape index: {}, may-alias: {4,5}]   ;;  %s873_s1 = inlined_call_operand.vmem [shape: s32[2], index: 1, kind: input, shape index: {}]  }
   0x1   :  { %s10_s20 = sshll.u32 %s868_s0, 4  ;;  %s14_s23 = sshll.u32 %s873_s1, 4  ;;  %s11_s20 = int_to_ptr.vmem [resolvable:$true] %s10_s20  ;;  %s15_s23 = int_to_ptr.vmem [resolvable:$true] %s14_s23 }
   0x2   :  { %s675_s24 = scalar_lea.vmem %s11_s20, 16  ;;  %p680_p1 = scmp.lt.s32.totalorder %s11_s20, %s11_s20 }
   0x3   :  { %p676_p0 = scmp.ne.s32.totalorder %s11_s20, %s675_s24  ;;  %p681_p2 = scmp.lt.s32.totalorder %s675_s24, %s675_s24 }
   0x5   :  { %p682_p3 = por %p681_p2, %p680_p1 }
   0x7   :  { %p683_p4 = pnand %p682_p3, %p676_p0 }
   0x9   :  { %686 = shalt.err (!%p683_p4)  }
   0xa   :  { %s741_s25 = smov [#allocation3]   ;;  %s687_s26 = scalar_lea.vmem %s15_s23, 16 }
   0xb   :  { %13 = dma.vmem_to_smem %s11_s20, 16, %s741_s25, [#allocation2] }
   0xc   :  { %p688_p5 = scmp.ne.s32.totalorder %s15_s23, %s687_s26  ;;  %p692_p6 = scmp.lt.s32.totalorder %s15_s23, %s15_s23 }
   0xd   :  { %p693_p7 = scmp.lt.s32.totalorder %s687_s26, %s687_s26 }
   0xf   :  { %p694_p8 = por %p693_p7, %p692_p6 }
  0x11   :  { %p695_p9 = pnand %p694_p8, %p688_p5 }
  0x13   :  { %698 = shalt.err (!%p695_p9)  }
  0x14   :  { %s742_s0 = smov [#allocation4]  }
  0x15   :  { %17 = dma.vmem_to_smem %s15_s23, 16, %s742_s0, [#allocation2] }
  0x16   :  { %719 = dma.done.wait [#allocation2], 32 }
  0x17   :  { %720 = vsyncadd [#allocation2], 4294967264 }
  0x18   :  { %19 = sfence }
  0x19   :  { %s782_s1 = smov 0   ;;  %s784_s27 = smov 0  }
  0x1a   :  { %s786_s28 = smov 0   ;;  %s788_s29 = smov 0  }
  0x1b   :  { %s790_s30 = smov 0  }
  0x1c LB: > { %s34_s6 = sadd.s32 1, %s731_s28  ;;  %s37_s7 = sadd.s32 1, %s735_s29  ;;  %s739_s30 = sphi %s790_s30, %s25_s30   ;;  %s735_s29 = sphi %s788_s29, %s877_s29   ;;  %s731_s28 = sphi %s786_s28, %s876_s28   ;;  %s727_s27 = sphi %s784_s27, %s875_s27   ;;  %s723_s1 = sphi %s782_s1, %s874_s1  }
  0x1d   : > { %p35_p10 = scmp.ge.s32.totalorder %s34_s6, 2  ;;  %p609_p11 = scmp.ge.s32.totalorder %s739_s30, 1 }
  0x1e   : > { %p262_p12 = scmp.lt.s32.totalorder %s739_s30, 5 }
  0x1f   : > { %s879_s6 = smov (%p35_p10, %s34_s6), 0  ;;  %s881_s7 = smov (!%p35_p10, %s37_s7), %s735_s29 }
  0x20   : > { %p263_p13 = pnand %p609_p11, %p262_p12  ;;  %p39_p0 = scmp.ge.s32.totalorder %s881_s7, 2 }
  0x21   : > { %s314_s8 = sld [smem:[#allocation3 + %s727_s27]] (!%p263_p13)  ;;  %p366_p1 = scmp.lt.s32.totalorder (!%p263_p13), %s727_s27, 1 }
  0x22   : > { %s883_s7 = smov (%p39_p0, %s881_s7), 0  ;;  %266 = sbr.rel (%p263_p13) target bundleno = 237 (0xed), region = 32 }
  0x23   : > { %s315_s9 = sld [smem:[#allocation4 + %s727_s27]] (!%p263_p13)  ;;  %p618_p10 = scmp.ne.s32.totalorder (!%p263_p13), %s723_s1, 0 }
  0x24   : > { %s340_s10 = sld [smem:[#allocation3 + %s727_s27]] (!%p263_p13) }
  0x25   : > { %s341_s11 = sld [smem:[#allocation4 + %s727_s27]] (!%p263_p13) }
  0x27   : > { %s316_s13 = sadd.s32 (!%p263_p13), 1, %s314_s8  ;;  %p320_p2 = scmp.gt.s32.totalorder (!%p263_p13), %s314_s8, %s723_s1 }
  0x29   : > { %s367_s12 = scalar_select %p366_p1, %s727_s27, 1 }
  0x2a   : > { %p317_p3 = scmp.gt.s32.totalorder %s315_s9, %s316_s13  ;;  %s342_s14 = sadd.s32 1, %s340_s10 }
  0x2b   : > { %s885_s8 = smov (!%p320_p2, %s314_s8), %s723_s1  ;;  %p343_p4 = scmp.gt.s32.totalorder %s341_s11, %s342_s14 }
  0x2c   : > { %s887_s9 = smov (!%p317_p3, %s315_s9), %s316_s13  ;;  %p346_p5 = scmp.gt.s32.totalorder %s340_s10, %s723_s1 }
  0x2d   : > { %s610_s15 = sadd.s32 4294967295, %s887_s9  ;;  %s616_s16 = sshll.u32 %s367_s12, 2 }
  0x2e   : > { %p322_p6 = scmp.lt.s32.totalorder %s610_s15, %s885_s8  ;;  %s369_s19 = scalar_lea.vmem %s871_s4, %s616_s16 }
  0x2f   : > { %s889_s11 = smov (!%p343_p4, %s341_s11), %s342_s14  ;;  %s831_s22 = scalar_lea.vmem %s872_s5, %s616_s16  ;;  %v378_v0 = vld [vmem:[%s369_s19] sm:$0x7] (!%p618_p10) }
  0x30   : > { %s891_s15 = smov (!%p322_p6, %s610_s15), %s885_s8  ;;  %s613_s24 = sadd.s32 4294967295, %s889_s11  ;;  %379 = vst [vmem:[%s831_s22] sm:$0x7] (!%p618_p10), %v378_v0 }
  0x31   : > { %s611_s23 = sshll.u32 %s891_s15, 1  ;;  %s893_s10 = smov (!%p346_p5, %s340_s10), %s723_s1 }
  0x32   : > { %p325_p7 = scmp.lt.s32.totalorder %s611_s23, 3  ;;  %p348_p8 = scmp.lt.s32.totalorder %s613_s24, %s893_s10 }
  0x34   : > { %s895_s23 = smov (!%p325_p7, %s611_s23), 3  ;;  %s897_s24 = smov (!%p348_p8, %s613_s24), %s893_s10 }
  0x35   : > { %s612_s25 = sshll.u32 %s895_s23, 3  ;;  %s614_s12 = sshll.u32 %s897_s24, 1 }
  0x36   : > { %s328_s9 = scalar_lea.vmem %s869_s2, %s612_s25  ;;  %p351_p9 = scmp.lt.s32.totalorder %s614_s12, 3 }
  0x37   : > { %377 = sbr.rel (%p618_p10) target bundleno = 62 (0x3e), region = 36 }
  0x38   : > { %s899_s12 = smov (!%p351_p9, %s614_s12), 3 }
  0x39   : > { %s615_s8 = sshll.u32 %s899_s12, 3 }
  0x3a   : > { %s354_s16 = scalar_lea.vmem %s870_s3, %s615_s8 }
  0x3e PF: > { %s380_s10 = sld [smem:[#allocation3 + %s727_s27]] }
  0x3f   : > { %s382_s11 = sld [smem:[#allocation4 + %s727_s27]] }
  0x44   : > { %p381_p11 = scmp.ge.s32.totalorder %s723_s1, %s380_s10 }
  0x45   : > { %p383_p12 = scmp.lt.s32.totalorder %s723_s1, %s382_s11 }
  0x47   : > { %p384_p13 = pnand %p383_p12, %p381_p11 }
  0x48   : > { %v398_v1 = vld [vmem:[%s328_s9] sm:$0xff] (!%p384_p13)  ;;  %v743_v3 = vmov (!%p384_p13), 0   ;;  %v620_v4 = vld [vmem:[%s328_s9 + $0x8] sm:$0xff] (!%p384_p13)  ;;  %v744_v5 = vmov (!%p384_p13), 1   ;;  %v745_v7 = vmov (!%p384_p13), 2   ;;  %v389_v8 = vlaneseq (!%p384_p13)  ;;  %s619_s1 = sshll.u32 (!%p384_p13), %s727_s27, 7 }
  0x49   : > { %387 = sbr.rel (%p384_p13) target bundleno = 237 (0xed), region = 40  ;;  %v399_v2 = vld [vmem:[%s354_s16] sm:$0xff] (!%p384_p13)  ;;  %669 = vset.pattern.permute.xlu0 (!%p384_p13), %v743_v3  ;;  %670 = vset.pattern.permute.xlu1 (!%p384_p13), %v743_v3  ;;  %v621_v6 = vld [vmem:[%s354_s16 + $0x8] sm:$0xff] (!%p384_p13)  ;;  %v391_v10 = vstv (!%p384_p13), %s619_s1 }
  0x4a   : > { %401 = vperm.xlu0 (!%p384_p13), %669, %v398_v1   ;;  %418 = vperm.xlu1 (!%p384_p13), %670, %v399_v2   ;;  %v390_v9 = vand.u32 (!%p384_p13), 127, %v389_v8  ;;  %v394_v12 = vshrl.u32 (!%p384_p13), %v389_v8, 7 }
  0x4c   : > { %v392_v11 = vadd.s32 (!%p384_p13), %v391_v10, %v390_v9  ;;  %v396_v9 = vld [vmem:[%s831_s22 + $0x1] sm:$0x1] (!%p384_p13)  ;;  %v397_v10 = vld [vmem:[%s831_s22 + $0x2] sm:$0x1] (!%p384_p13) }
  0x4e   : > { %458 = vperm.xlu0 (!%p384_p13), %669, %v620_v4   ;;  %671 = vset.pattern.permute.xlu1 (!%p384_p13), %v744_v5 }
  0x4f   : > { %430 = vperm.xlu1 (!%p384_p13), %671, %v399_v2  }
  0x52   : > { %672 = vset.pattern.permute.xlu0 %v745_v7 }
  0x53   : > { %442 = vperm.xlu0 %672, %v399_v2   ;;  %673 = vset.pattern.permute.xlu1 %v743_v3 }
  0x54   : > { %475 = vperm.xlu1 %673, %v621_v6  }
  0x57   : > { %499 = vperm.xlu0 %672, %v621_v6  }
  0x58   : > { %674 = vset.pattern.permute.xlu1 %v744_v5  ;;  %v395_v5 = vld [vmem:[%s831_s22] sm:$0x1] }
  0x59   : > { %487 = vperm.xlu1 %674, %v621_v6  }
  0xc9   : > { %v402_v13 = vpop.permute.xlu0 %401  ;;  %v419_v14 = vpop.permute.xlu1 %418 }
  0xca   : > { %vm403_vm0 = vcmp.eq.s32.totalorder %v402_v13, %v392_v11 }
  0xcb   : > { %v404_v15 = vsel %vm403_vm0, %v394_v12, 4294967295 }
  0xcc   : > { %v405_v16 = vrot.slane %v404_v15, 4 }
  0xcd   : > { %v459_v17 = vpop.permute.xlu0 %458 }
  0xce   : > { %vm406_vm1 = vcmp.gt.s32.totalorder %v404_v15, %v405_v16  ;;  %vm460_vm2 = vcmp.eq.s32.totalorder %v459_v17, %v392_v11  ;;  %v431_v18 = vpop.permute.xlu1 %430 }
  0xcf   : > { %v407_v19 = vsel %vm406_vm1, %v404_v15, %v405_v16  ;;  %v461_v20 = vsel %vm460_vm2, %v394_v12, 4294967295 }
  0xd0   : > { %v408_v21 = vrot.slane %v407_v19, 2  ;;  %v462_v22 = vrot.slane %v461_v20, 4 }
  0xd2   : > { %vm409_vm3 = vcmp.gt.s32.totalorder %v407_v19, %v408_v21  ;;  %vm463_vm4 = vcmp.gt.s32.totalorder %v461_v20, %v462_v22  ;;  %v443_v28 = vpop.permute.xlu0 %442 }
  0xd3   : > { %v410_v23 = vsel %vm409_vm3, %v407_v19, %v408_v21  ;;  %v464_v24 = vsel %vm463_vm4, %v461_v20, %v462_v22  ;;  %v476_v27 = vpop.permute.xlu1 %475 }
  0xd4   : > { %v411_v25 = vrot.slane %v410_v23, 1  ;;  %v465_v26 = vrot.slane %v464_v24, 2 }
  0xd6   : > { %vm412_vm5 = vcmp.gt.s32.totalorder %v410_v23, %v411_v25  ;;  %vm466_vm6 = vcmp.gt.s32.totalorder %v464_v24, %v465_v26  ;;  %v500_v43 = vpop.permute.xlu0 %499 }
  0xd7   : > { %v413_v29 = vsel %vm412_vm5, %v410_v23, %v411_v25  ;;  %v467_v30 = vsel %vm466_vm6, %v464_v24, %v465_v26 }
  0xd8   : > { %vm414_vm7 = vcmp.eq.s32.totalorder %v404_v15, %v413_v29  ;;  %v468_v31 = vrot.slane %v467_v30, 1  ;;  %v488_v38 = vpop.permute.xlu1 %487  ;;  %vm415_vm10 = vcmp.ge.s32.totalorder %v413_v29, 0 }
  0xd9   : > { %v421_v32 = vsel %vm414_vm7, %v419_v14, -inf  ;;  %v433_v33 = vsel %vm414_vm7, %v431_v18, -inf  ;;  %v445_v34 = vsel %vm414_vm7, %v443_v28, -inf }
  0xda   : > { %v422_v35 = vrot.slane %v421_v32, 4  ;;  %v434_v36 = vrot.slane %v433_v33, 4  ;;  %v446_v37 = vrot.slane %v445_v34, 4  ;;  %vm469_vm8 = vcmp.gt.s32.totalorder %v467_v30, %v468_v31 }
  0xdb   : > { %v470_v39 = vsel %vm469_vm8, %v467_v30, %v468_v31 }
  0xdc   : > { %v423_v40 = vmax.f32 %v421_v32, %v422_v35  ;;  %v435_v41 = vmax.f32 %v433_v33, %v434_v36  ;;  %v447_v42 = vmax.f32 %v445_v34, %v446_v37  ;;  %vm471_vm9 = vcmp.eq.s32.totalorder %v461_v20, %v470_v39 }
  0xdd   : > { %v478_v44 = vsel %vm471_vm9, %v476_v27, -inf  ;;  %v502_v45 = vsel %vm471_vm9, %v500_v43, -inf  ;;  %v490_v46 = vsel %vm471_vm9, %v488_v38, -inf  ;;  %vm472_vm11 = vcmp.ge.s32.totalorder %v470_v39, 0 }
  0xde   : > { %v424_v47 = vrot.slane %v423_v40, 2  ;;  %v436_v48 = vrot.slane %v435_v41, 2  ;;  %v448_v49 = vrot.slane %v447_v42, 2  ;;  %v479_v50 = vrot.slane %v478_v44, 4 }
  0xdf   : > { %v503_v51 = vrot.slane %v502_v45, 4  ;;  %v491_v52 = vrot.slane %v490_v46, 4 }
  0xe0   : > { %v425_v53 = vmax.f32 %v423_v40, %v424_v47  ;;  %v437_v54 = vmax.f32 %v435_v41, %v436_v48  ;;  %v449_v55 = vmax.f32 %v447_v42, %v448_v49  ;;  %v480_v56 = vmax.f32 %v478_v44, %v479_v50 }
  0xe1   : > { %v504_v57 = vmax.f32 %v502_v45, %v503_v51  ;;  %v492_v58 = vmax.f32 %v490_v46, %v491_v52 }
  0xe2   : > { %v426_v59 = vrot.slane %v425_v53, 1  ;;  %v438_v60 = vrot.slane %v437_v54, 1  ;;  %v450_v61 = vrot.slane %v449_v55, 1  ;;  %v481_v62 = vrot.slane %v480_v56, 2 }
  0xe3   : > { %v505_v63 = vrot.slane %v504_v57, 2  ;;  %v493_v0 = vrot.slane %v492_v58, 2 }
  0xe4   : > { %v482_v1 = vmax.f32 %v480_v56, %v481_v62  ;;  %v427_v2 = vmax.f32 %v425_v53, %v426_v59  ;;  %v439_v6 = vmax.f32 %v437_v54, %v438_v60  ;;  %v451_v7 = vmax.f32 %v449_v55, %v450_v61 }
  0xe5   : > { %v506_v3 = vmax.f32 %v504_v57, %v505_v63  ;;  %v494_v4 = vmax.f32 %v492_v58, %v493_v0 }
  0xe6   : > { %v483_v8 = vrot.slane %v482_v1, 1  ;;  %v428_v14 = vsel %vm415_vm10, %v427_v2, %v395_v5  ;;  %v440_v17 = vsel %vm415_vm10, %v439_v6, %v396_v9  ;;  %v452_v18 = vsel %vm415_vm10, %v451_v7, %v397_v10 }
  0xe7   : > { %v507_v11 = vrot.slane %v506_v3, 1  ;;  %v495_v12 = vrot.slane %v494_v4, 1 }
  0xe8   : > { %v484_v13 = vmax.f32 %v482_v1, %v483_v8 }
  0xe9   : > { %v508_v15 = vmax.f32 %v506_v3, %v507_v11  ;;  %v496_v16 = vmax.f32 %v494_v4, %v495_v12 }
  0xea   : > { %v485_v19 = vsel %vm472_vm11, %v484_v13, %v428_v14 }
  0xeb   : > { %510 = vst [vmem:[%s831_s22] sm:$0x1] %v485_v19  ;;  %v509_v20 = vsel %vm472_vm11, %v508_v15, %v452_v18  ;;  %v497_v21 = vsel %vm472_vm11, %v496_v16, %v440_v17 }
  0xec   : > { %512 = vst [vmem:[%s831_s22 + $0x2] sm:$0x1] %v509_v20  ;;  %511 = vst [vmem:[%s831_s22 + $0x1] sm:$0x1] %v497_v21 }
  0xed PF: > { %s25_s30 = sadd.s32 1, %s739_s30   ;;  %s874_s1 = smov %s731_s28 }
  0xee   : > { %p22_p0 = scmp.ge.s32.totalorder %s25_s30, 6   ;;  %s875_s27 = smov %s735_s29 }
  0xef   : > { %s876_s28 = smov %s879_s6  ;;  %s877_s29 = smov %s883_s7 }
  0xf0   :  { %24 = sbr.rel (!%p22_p0) target bundleno = 28 (0x1c), region = 78 }

</bundles_post_ra>
